<compile_context>
chip_gen: v7x
topology: tpu7x:2x2x1
jax: 0.10.0
libtpu: 0.0.40
codegen_flags: <defaults>
</compile_context>

<pallas_src>
import functools

import jax
import jax.numpy as jnp
import numpy as np
from jax.experimental import pallas as pl
from jax.experimental.pallas import tpu as pltpu

EPS = 1e-5    # PyTorch LayerNorm default eps
LANE = 128    # TPU lane width


def _round_up(x, m):
    return (x + m - 1) // m * m


def _layernorm(x, gamma, beta, inv_n):
    # Fused-moments LayerNorm: one VALU sweep, back-to-back XLU reductions.
    s = jnp.sum(x, axis=-1, keepdims=True)
    s2 = jnp.sum(x * x, axis=-1, keepdims=True)
    mean = s * inv_n
    var = s2 * inv_n - mean * mean          # biased, like PyTorch
    inv = jax.lax.rsqrt(var + EPS)
    return (x - mean) * inv * gamma + beta


def trading_reward_kernel(
    state_ref,   # [TILE_B, H]  mm_dtype (bf16 or f32)
    w1_ref,      # [H, H]       (in, out)
    w2_ref,      # [H, H]
    wr_ref,      # [H, RPAD]    lane-padded reward head
    vecs_ref,    # [8, H]  rows: b1, g1, be1, b2, g2, be2, gln, bln   (f32)
    br_ref,      # [1, RPAD]    lane-padded reward bias (f32)
    out_ref,     # [TILE_B, RPAD]
):
    # NOTE: every op below is strictly row-wise over the batch tile, so the
    # unspecified garbage rows of a partial last block never contaminate valid
    # rows, and Pallas drops their writes.  Do NOT add cross-row reductions
    # without reinstating explicit batch padding / masking.
    mm_dtype = w1_ref.dtype               # bf16 touches only MXU operands
    x_mm = state_ref[...]
    x = x_mm.astype(jnp.float32)          # VPU math stays f32

    vecs = vecs_ref[...]
    b1, g1, be1 = vecs[0:1, :], vecs[1:2, :], vecs[2:3, :]
    b2, g2, be2 = vecs[3:4, :], vecs[4:5, :], vecs[5:6, :]
    gln, bln = vecs[6:7, :], vecs[7:8, :]

    inv_h = 1.0 / x.shape[-1]

    # --- ImproveResidualBlock: relu(ln2(fc2(relu(ln1(fc1(x))))) + x) ---
    h = jnp.dot(x_mm.astype(mm_dtype), w1_ref[...],
                preferred_element_type=jnp.float32) + b1
    h = _layernorm(h, g1, be1, inv_h)
    h = jnp.maximum(h, 0.0)

    h = jnp.dot(h.astype(mm_dtype), w2_ref[...],
                preferred_element_type=jnp.float32) + b2
    h = _layernorm(h, g2, be2, inv_h)
    h = jnp.maximum(h + x, 0.0)

    # --- final LayerNorm ---
    h = _layernorm(h, gln, bln, inv_h)

    # --- reward head (lane-dense, zero-padded columns) ---
    r = jnp.dot(h.astype(wr_ref.dtype), wr_ref[...],
                preferred_element_type=jnp.float32) + br_ref[...]
    out_ref[...] = r.astype(out_ref.dtype)


def prepare_params(params, matmul_dtype=jnp.bfloat16):
    """One-time weight packing (hoisted out of the forward, per perf review):
       lane-pad the reward head to a multiple of 128, pack the eight [1, H]
       bias/scale vectors into one (8, H) operand, cast MXU operands."""
    H, R = params["wr"].shape
    rpad = _round_up(max(R, LANE), LANE)
    vecs = jnp.concatenate(
        [params["b1"], params["g1"], params["be1"],
         params["b2"], params["g2"], params["be2"],
         params["gln"], params["bln"]], axis=0).astype(jnp.float32)
    return {
        "w1": params["w1"].astype(matmul_dtype),
        "w2": params["w2"].astype(matmul_dtype),
        "wr": jnp.pad(params["wr"], ((0, 0), (0, rpad - R))).astype(matmul_dtype),
        "br": jnp.pad(params["br"], ((0, 0), (0, rpad - R))).astype(jnp.float32),
        "vecs": vecs,
    }


@functools.partial(jax.jit,
                   static_argnames=("reward_support_size", "tile_b", "trim_output"))
def trading_reward_forward(state, packed, *, reward_support_size=None,
                           tile_b=None, trim_output=True):
    """state: [B, hidden_size] -> (reward [B, R] f32, None).  `packed` comes from prepare_params()."""
    B, H = state.shape
    rpad = packed["wr"].shape[1]
    mm_dtype = packed["w1"].dtype

    # Cast state at the HBM boundary: halves the dominant input DMA when the MXU
    # operands are bf16 (and lets callers hand bf16 state straight through).
    if state.dtype != mm_dtype:
        state = state.astype(mm_dtype)

    # Batch tiling: kernel is HBM/per-step-overhead bound at H=128, so use big tiles,
    # but keep >=2 tiles once B >= 64 so v7x's two TensorCores both get work.
    if tile_b is None:
        if B >= 64:
            tile_b = min(1024, _round_up(pl.cdiv(B, 2), 8))
        else:
            tile_b = _round_up(B, 8)
    grid = (pl.cdiv(B, tile_b),)   # partial last block handled by Pallas masking (no jnp.pad)

    # Rough VMEM budget: double-buffered state/out tiles + resident weights, with 2x headroom.
    vmem_bytes = (
        2 * tile_b * H * mm_dtype.itemsize          # state tiles
        + 2 * tile_b * rpad * 4                     # output tiles (f32)
        + 2 * (2 * H * H + H * rpad) * mm_dtype.itemsize   # w1, w2, wr
        + 2 * (8 * H + rpad) * 4)                   # vecs, br
    vmem_limit = int(min(max(2 * vmem_bytes, 16 * 1024 * 1024), 64 * 1024 * 1024))

    out = pl.pallas_call(
        trading_reward_kernel,
        out_shape=jax.ShapeDtypeStruct((B, rpad), jnp.float32),
        grid=grid,
        in_specs=[
            pl.BlockSpec((tile_b, H), lambda i: (i, 0)),   # state: tiled over batch
            # Constant block index => loaded once, VMEM-resident across grid steps.
            # (pipeline_mode=pl.Buffered(1) would halve resident-weight VMEM; omitted
            #  here since it is noise at H=128.)
            pl.BlockSpec((H, H), lambda i: (0, 0)),        # w1
            pl.BlockSpec((H, H), lambda i: (0, 0)),        # w2
            pl.BlockSpec((H, rpad), lambda i: (0, 0)),     # wr (lane-padded)
            pl.BlockSpec((8, H), lambda i: (0, 0)),        # packed bias/scale vectors
            pl.BlockSpec((1, rpad), lambda i: (0, 0)),     # br (lane-padded)
        ],
        out_specs=pl.BlockSpec((tile_b, rpad), lambda i: (i, 0)),
        compiler_params=pltpu.CompilerParams(
            # batch tiles are independent -> shard across v7x's 2 TCs (no-op on v5e/v6e)
            dimension_semantics=("parallel",),
            vmem_limit_bytes=vmem_limit),
    )(state, packed["w1"], packed["w2"], packed["wr"], packed["vecs"], packed["br"])

    if trim_output and reward_support_size is not None and reward_support_size != rpad:
        out = out[:, :reward_support_size]   # batch dim is exact; only the cheap column slice remains

    # value_prefix=False => reward_hidden passes through unchanged (None here).
    # TODO(synk): value_prefix=True LSTM branch (nn.LSTM single-step) not implemented in Pallas.
    return out, None


def init_params(key, hidden_size, reward_support_size):
    ks = jax.random.split(key, 6)
    scale = 1.0 / np.sqrt(hidden_size)
    # Weights stored pre-transposed as [in, out] so the kernel does x @ W.
    return {
        "w1": jax.random.uniform(ks[0], (hidden_size, hidden_size), jnp.float32, -scale, scale),
        "b1": jax.random.uniform(ks[1], (1, hidden_size), jnp.float32, -scale, scale),
        "g1": jnp.ones((1, hidden_size), jnp.float32),
        "be1": jnp.zeros((1, hidden_size), jnp.float32),
        "w2": jax.random.uniform(ks[2], (hidden_size, hidden_size), jnp.float32, -scale, scale),
        "b2": jax.random.uniform(ks[3], (1, hidden_size), jnp.float32, -scale, scale),
        "g2": jnp.ones((1, hidden_size), jnp.float32),
        "be2": jnp.zeros((1, hidden_size), jnp.float32),
        "gln": jnp.ones((1, hidden_size), jnp.float32),
        "bln": jnp.zeros((1, hidden_size), jnp.float32),
        "wr": jax.random.uniform(ks[4], (hidden_size, reward_support_size), jnp.float32, -scale, scale),
        "br": jax.random.uniform(ks[5], (1, reward_support_size), jnp.float32, -scale, scale),
    }


def reference_forward(state, p):
    """Pure-JAX reference mirroring the PyTorch forward (value_prefix=False).
       Uses a two-pass LayerNorm (mean, then centered variance) so it is an
       independent formulation from the kernel's fused-moments LayerNorm."""
    def ln(x, gamma, beta):
        mean = jnp.mean(x, axis=-1, keepdims=True)
        var = jnp.mean(jnp.square(x - mean), axis=-1, keepdims=True)
        return (x - mean) * jax.lax.rsqrt(var + EPS) * gamma + beta

    x = state
    h = x @ p["w1"] + p["b1"]
    h = jnp.maximum(ln(h, p["g1"], p["be1"]), 0.0)
    h = h @ p["w2"] + p["b2"]
    h = jnp.maximum(ln(h, p["g2"], p["be2"]) + x, 0.0)
    h = ln(h, p["gln"], p["bln"])
    return h @ p["wr"] + p["br"]


if __name__ == "__main__":
    B = 8
    HIDDEN = 128
    REWARD_SUPPORT = 61   # deliberately non-lane-aligned to exercise the padded reward head

    key = jax.random.PRNGKey(0)
    k_state, k_params, k_big = jax.random.split(key, 3)
    state = jax.random.normal(k_state, (B, HIDDEN), dtype=jnp.float32)
    params = init_params(k_params, HIDDEN, REWARD_SUPPORT)

    ref = jax.block_until_ready(reference_forward(state, params))

    # --- f32 MXU operands: tight check against the independent two-pass-LN reference ---
    packed_f32 = prepare_params(params, matmul_dtype=jnp.float32)
    reward, reward_hidden = trading_reward_forward(
        state, packed_f32, reward_support_size=REWARD_SUPPORT)
    reward = jax.block_until_ready(reward)
    assert reward.shape == (B, REWARD_SUPPORT)
    assert reward_hidden is None
    assert np.allclose(np.asarray(reward), np.asarray(ref), atol=2e-3, rtol=2e-3), \
        "Pallas kernel mismatch vs reference (f32, small batch)"

    # --- larger batch: B=300 -> tile_b=152, grid=(2,), partial (masked) last block ---
    big_state = jax.random.normal(k_big, (300, HIDDEN), dtype=jnp.float32)
    big_reward, _ = trading_reward_forward(
        big_state, packed_f32, reward_support_size=REWARD_SUPPORT)
    big_reward = jax.block_until_ready(big_reward)
    big_ref = jax.block_until_ready(reference_forward(big_state, params))
    assert big_reward.shape == (300, REWARD_SUPPORT)
    assert np.allclose(np.asarray(big_reward), np.asarray(big_ref), atol=2e-3, rtol=2e-3), \
        "Pallas kernel mismatch vs reference (f32, batched grid / partial last block)"

    # --- bf16 MXU operands (the default; mandatory-ish on v5e): statistical check vs f32 ref ---
    packed_bf16 = prepare_params(params)   # matmul_dtype defaults to bf16
    bf16_reward, _ = trading_reward_forward(
        state, packed_bf16, reward_support_size=REWARD_SUPPORT)
    bf16_reward = np.asarray(jax.block_until_ready(bf16_reward))
    assert bf16_reward.shape == (B, REWARD_SUPPORT)
    assert np.all(np.isfinite(bf16_reward))
    err = np.abs(bf16_reward - np.asarray(ref))
    assert err.max() < 0.12 and err.mean() < 0.025, \
        f"bf16-operand path diverged from f32 reference (max={err.max():.4f}, mean={err.mean():.4f})"

    # --- lane-padded hand-off (skips the post-kernel column slice entirely) ---
    padded_reward, _ = trading_reward_forward(state, packed_bf16, trim_output=False)
    padded_reward = jax.block_until_ready(padded_reward)
    assert padded_reward.shape == (B, _round_up(REWARD_SUPPORT, LANE))

    print("KERNEL_OK")
</pallas_src>

<mosaic_0001>
module attributes {stable_mosaic.version = 11 : i64} {
  func.func @trading_reward_kernel(%arg0: i32, %arg1: memref<8x128xf32, #tpu.memory_space<vmem>>, %arg2: memref<128x128xf32, #tpu.memory_space<vmem>>, %arg3: memref<128x128xf32, #tpu.memory_space<vmem>>, %arg4: memref<128x128xf32, #tpu.memory_space<vmem>>, %arg5: memref<8x128xf32, #tpu.memory_space<vmem>>, %arg6: memref<1x128xf32, #tpu.memory_space<vmem>>, %arg7: memref<8x128xf32, #tpu.memory_space<vmem>>) attributes {dimension_semantics = [#tpu.dimension_semantics<parallel>], iteration_bounds = array<i64: 1>, scalar_prefetch = 0 : i64, scratch_operands = 0 : i64, tpu.core_type = #tpu.core_type<tc>, window_params = [{transform_indices = @transform_0, window_bounds = array<i64: 8, 128>}, {pipeline_mode = #tpu.pipeline_mode<synchronous>, transform_indices = @transform_1, window_bounds = array<i64: 128, 128>}, {pipeline_mode = #tpu.pipeline_mode<synchronous>, transform_indices = @transform_2, window_bounds = array<i64: 128, 128>}, {pipeline_mode = #tpu.pipeline_mode<synchronous>, transform_indices = @transform_3, window_bounds = array<i64: 128, 128>}, {pipeline_mode = #tpu.pipeline_mode<synchronous>, transform_indices = @transform_4, window_bounds = array<i64: 8, 128>}, {pipeline_mode = #tpu.pipeline_mode<synchronous>, transform_indices = @transform_5, window_bounds = array<i64: 1, 128>}, {transform_indices = @transform_6, window_bounds = array<i64: 8, 128>}]} {
    %c0 = arith.constant 0 : index
    %c0_0 = arith.constant 0 : index
    %0 = vector.load %arg1[%c0, %c0_0] : memref<8x128xf32, #tpu.memory_space<vmem>>, vector<8x128xf32>
    %c0_1 = arith.constant 0 : index
    %c0_2 = arith.constant 0 : index
    %1 = vector.load %arg5[%c0_1, %c0_2] : memref<8x128xf32, #tpu.memory_space<vmem>>, vector<8x128xf32>
    %2 = vector.extract_strided_slice %1 {offsets = [0, 0], sizes = [1, 128], strides = [1, 1]} : vector<8x128xf32> to vector<1x128xf32>
    %3 = vector.extract_strided_slice %1 {offsets = [1, 0], sizes = [1, 128], strides = [1, 1]} : vector<8x128xf32> to vector<1x128xf32>
    %4 = vector.extract_strided_slice %1 {offsets = [2, 0], sizes = [1, 128], strides = [1, 1]} : vector<8x128xf32> to vector<1x128xf32>
    %5 = vector.extract_strided_slice %1 {offsets = [3, 0], sizes = [1, 128], strides = [1, 1]} : vector<8x128xf32> to vector<1x128xf32>
    %6 = vector.extract_strided_slice %1 {offsets = [4, 0], sizes = [1, 128], strides = [1, 1]} : vector<8x128xf32> to vector<1x128xf32>
    %7 = vector.extract_strided_slice %1 {offsets = [5, 0], sizes = [1, 128], strides = [1, 1]} : vector<8x128xf32> to vector<1x128xf32>
    %8 = vector.extract_strided_slice %1 {offsets = [6, 0], sizes = [1, 128], strides = [1, 1]} : vector<8x128xf32> to vector<1x128xf32>
    %9 = vector.extract_strided_slice %1 {offsets = [7, 0], sizes = [1, 128], strides = [1, 1]} : vector<8x128xf32> to vector<1x128xf32>
    %c0_3 = arith.constant 0 : index
    %c0_4 = arith.constant 0 : index
    %10 = vector.load %arg2[%c0_3, %c0_4] : memref<128x128xf32, #tpu.memory_space<vmem>>, vector<128x128xf32>
    %cst = arith.constant dense<0.000000e+00> : vector<8x128xf32>
    %11 = tpu.matmul %0, %10, %cst {dimension_numbers = #tpu.dot_dimension_numbers<[1], [0], [0], [1], [0, 0, 1, 1], [], []>} : vector<8x128xf32>, vector<128x128xf32>, vector<8x128xf32> -> vector<8x128xf32>
    %12 = vector.broadcast %2 : vector<1x128xf32> to vector<8x128xf32>
    %13 = arith.addf %11, %12 : vector<8x128xf32>
    %cst_5 = arith.constant dense<0.000000e+00> : vector<8xf32>
    %14 = vector.multi_reduction <add>, %13, %cst_5 [1] : vector<8x128xf32> to vector<8xf32>
    %15 = vector.shape_cast %14 : vector<8xf32> to vector<8x1xf32>
    %16 = arith.mulf %13, %13 : vector<8x128xf32>
    %cst_6 = arith.constant dense<0.000000e+00> : vector<8xf32>
    %17 = vector.multi_reduction <add>, %16, %cst_6 [1] : vector<8x128xf32> to vector<8xf32>
    %18 = vector.shape_cast %17 : vector<8xf32> to vector<8x1xf32>
    %cst_7 = arith.constant 7.812500e-03 : f32
    %19 = vector.broadcast %cst_7 : f32 to vector<8x1xf32>
    %20 = arith.mulf %15, %19 : vector<8x1xf32>
    %cst_8 = arith.constant 7.812500e-03 : f32
    %21 = vector.broadcast %cst_8 : f32 to vector<8x1xf32>
    %22 = arith.mulf %18, %21 : vector<8x1xf32>
    %23 = arith.mulf %20, %20 : vector<8x1xf32>
    %24 = arith.subf %22, %23 : vector<8x1xf32>
    %cst_9 = arith.constant 9.99999974E-6 : f32
    %25 = vector.broadcast %cst_9 : f32 to vector<8x1xf32>
    %26 = arith.addf %24, %25 : vector<8x1xf32>
    %27 = math.rsqrt %26 : vector<8x1xf32>
    %28 = vector.broadcast %20 : vector<8x1xf32> to vector<8x128xf32>
    %29 = arith.subf %13, %28 : vector<8x128xf32>
    %30 = vector.broadcast %27 : vector<8x1xf32> to vector<8x128xf32>
    %31 = arith.mulf %29, %30 : vector<8x128xf32>
    %32 = vector.broadcast %3 : vector<1x128xf32> to vector<8x128xf32>
    %33 = arith.mulf %31, %32 : vector<8x128xf32>
    %34 = vector.broadcast %4 : vector<1x128xf32> to vector<8x128xf32>
    %35 = arith.addf %33, %34 : vector<8x128xf32>
    %cst_10 = arith.constant 0.000000e+00 : f32
    %36 = vector.broadcast %cst_10 : f32 to vector<8x128xf32>
    %37 = arith.maximumf %35, %36 : vector<8x128xf32>
    %c0_11 = arith.constant 0 : index
    %c0_12 = arith.constant 0 : index
    %38 = vector.load %arg3[%c0_11, %c0_12] : memref<128x128xf32, #tpu.memory_space<vmem>>, vector<128x128xf32>
    %cst_13 = arith.constant dense<0.000000e+00> : vector<8x128xf32>
    %39 = tpu.matmul %37, %38, %cst_13 {dimension_numbers = #tpu.dot_dimension_numbers<[1], [0], [0], [1], [0, 0, 1, 1], [], []>} : vector<8x128xf32>, vector<128x128xf32>, vector<8x128xf32> -> vector<8x128xf32>
    %40 = vector.broadcast %5 : vector<1x128xf32> to vector<8x128xf32>
    %41 = arith.addf %39, %40 : vector<8x128xf32>
    %cst_14 = arith.constant dense<0.000000e+00> : vector<8xf32>
    %42 = vector.multi_reduction <add>, %41, %cst_14 [1] : vector<8x128xf32> to vector<8xf32>
    %43 = vector.shape_cast %42 : vector<8xf32> to vector<8x1xf32>
    %44 = arith.mulf %41, %41 : vector<8x128xf32>
    %cst_15 = arith.constant dense<0.000000e+00> : vector<8xf32>
    %45 = vector.multi_reduction <add>, %44, %cst_15 [1] : vector<8x128xf32> to vector<8xf32>
    %46 = vector.shape_cast %45 : vector<8xf32> to vector<8x1xf32>
    %cst_16 = arith.constant 7.812500e-03 : f32
    %47 = vector.broadcast %cst_16 : f32 to vector<8x1xf32>
    %48 = arith.mulf %43, %47 : vector<8x1xf32>
    %cst_17 = arith.constant 7.812500e-03 : f32
    %49 = vector.broadcast %cst_17 : f32 to vector<8x1xf32>
    %50 = arith.mulf %46, %49 : vector<8x1xf32>
    %51 = arith.mulf %48, %48 : vector<8x1xf32>
    %52 = arith.subf %50, %51 : vector<8x1xf32>
    %cst_18 = arith.constant 9.99999974E-6 : f32
    %53 = vector.broadcast %cst_18 : f32 to vector<8x1xf32>
    %54 = arith.addf %52, %53 : vector<8x1xf32>
    %55 = math.rsqrt %54 : vector<8x1xf32>
    %56 = vector.broadcast %48 : vector<8x1xf32> to vector<8x128xf32>
    %57 = arith.subf %41, %56 : vector<8x128xf32>
    %58 = vector.broadcast %55 : vector<8x1xf32> to vector<8x128xf32>
    %59 = arith.mulf %57, %58 : vector<8x128xf32>
    %60 = vector.broadcast %6 : vector<1x128xf32> to vector<8x128xf32>
    %61 = arith.mulf %59, %60 : vector<8x128xf32>
    %62 = vector.broadcast %7 : vector<1x128xf32> to vector<8x128xf32>
    %63 = arith.addf %61, %62 : vector<8x128xf32>
    %64 = arith.addf %63, %0 : vector<8x128xf32>
    %cst_19 = arith.constant 0.000000e+00 : f32
    %65 = vector.broadcast %cst_19 : f32 to vector<8x128xf32>
    %66 = arith.maximumf %64, %65 : vector<8x128xf32>
    %cst_20 = arith.constant dense<0.000000e+00> : vector<8xf32>
    %67 = vector.multi_reduction <add>, %66, %cst_20 [1] : vector<8x128xf32> to vector<8xf32>
    %68 = vector.shape_cast %67 : vector<8xf32> to vector<8x1xf32>
    %69 = arith.mulf %66, %66 : vector<8x128xf32>
    %cst_21 = arith.constant dense<0.000000e+00> : vector<8xf32>
    %70 = vector.multi_reduction <add>, %69, %cst_21 [1] : vector<8x128xf32> to vector<8xf32>
    %71 = vector.shape_cast %70 : vector<8xf32> to vector<8x1xf32>
    %cst_22 = arith.constant 7.812500e-03 : f32
    %72 = vector.broadcast %cst_22 : f32 to vector<8x1xf32>
    %73 = arith.mulf %68, %72 : vector<8x1xf32>
    %cst_23 = arith.constant 7.812500e-03 : f32
    %74 = vector.broadcast %cst_23 : f32 to vector<8x1xf32>
    %75 = arith.mulf %71, %74 : vector<8x1xf32>
    %76 = arith.mulf %73, %73 : vector<8x1xf32>
    %77 = arith.subf %75, %76 : vector<8x1xf32>
    %cst_24 = arith.constant 9.99999974E-6 : f32
    %78 = vector.broadcast %cst_24 : f32 to vector<8x1xf32>
    %79 = arith.addf %77, %78 : vector<8x1xf32>
    %80 = math.rsqrt %79 : vector<8x1xf32>
    %81 = vector.broadcast %73 : vector<8x1xf32> to vector<8x128xf32>
    %82 = arith.subf %66, %81 : vector<8x128xf32>
    %83 = vector.broadcast %80 : vector<8x1xf32> to vector<8x128xf32>
    %84 = arith.mulf %82, %83 : vector<8x128xf32>
    %85 = vector.broadcast %8 : vector<1x128xf32> to vector<8x128xf32>
    %86 = arith.mulf %84, %85 : vector<8x128xf32>
    %87 = vector.broadcast %9 : vector<1x128xf32> to vector<8x128xf32>
    %88 = arith.addf %86, %87 : vector<8x128xf32>
    %c0_25 = arith.constant 0 : index
    %c0_26 = arith.constant 0 : index
    %89 = vector.load %arg4[%c0_25, %c0_26] : memref<128x128xf32, #tpu.memory_space<vmem>>, vector<128x128xf32>
    %cst_27 = arith.constant dense<0.000000e+00> : vector<8x128xf32>
    %90 = tpu.matmul %88, %89, %cst_27 {dimension_numbers = #tpu.dot_dimension_numbers<[1], [0], [0], [1], [0, 0, 1, 1], [], []>} : vector<8x128xf32>, vector<128x128xf32>, vector<8x128xf32> -> vector<8x128xf32>
    %c0_28 = arith.constant 0 : index
    %c0_29 = arith.constant 0 : index
    %91 = vector.load %arg6[%c0_28, %c0_29] : memref<1x128xf32, #tpu.memory_space<vmem>>, vector<1x128xf32>
    %92 = vector.broadcast %91 : vector<1x128xf32> to vector<8x128xf32>
    %93 = arith.addf %90, %92 : vector<8x128xf32>
    %c0_30 = arith.constant 0 : index
    %c0_31 = arith.constant 0 : index
    %94 = vector.load %arg7[%c0_30, %c0_31] : memref<8x128xf32, #tpu.memory_space<vmem>>, vector<8x128xf32>
    tpu.vector_store %arg7[%c0_30, %c0_31], %93 {strides = array<i32>} : memref<8x128xf32, #tpu.memory_space<vmem>>, vector<8x128xf32>,
    return
  }
  func.func @transform_0(%arg0: i32) -> (i32, i32) {
    %c0_i32 = arith.constant 0 : i32
    %c0_i32_0 = arith.constant 0 : i32
    return %arg0, %c0_i32 : i32, i32
  }
  func.func @transform_1(%arg0: i32) -> (i32, i32) {
    %c0_i32 = arith.constant 0 : i32
    %c0_i32_0 = arith.constant 0 : i32
    %c0_i32_1 = arith.constant 0 : i32
    return %c0_i32, %c0_i32_0 : i32, i32
  }
  func.func @transform_2(%arg0: i32) -> (i32, i32) {
    %c0_i32 = arith.constant 0 : i32
    %c0_i32_0 = arith.constant 0 : i32
    %c0_i32_1 = arith.constant 0 : i32
    return %c0_i32, %c0_i32_0 : i32, i32
  }
  func.func @transform_3(%arg0: i32) -> (i32, i32) {
    %c0_i32 = arith.constant 0 : i32
    %c0_i32_0 = arith.constant 0 : i32
    %c0_i32_1 = arith.constant 0 : i32
    return %c0_i32, %c0_i32_0 : i32, i32
  }
  func.func @transform_4(%arg0: i32) -> (i32, i32) {
    %c0_i32 = arith.constant 0 : i32
    %c0_i32_0 = arith.constant 0 : i32
    %c0_i32_1 = arith.constant 0 : i32
    return %c0_i32, %c0_i32_0 : i32, i32
  }
  func.func @transform_5(%arg0: i32) -> (i32, i32) {
    %c0_i32 = arith.constant 0 : i32
    %c0_i32_0 = arith.constant 0 : i32
    %c0_i32_1 = arith.constant 0 : i32
    return %c0_i32, %c0_i32_0 : i32, i32
  }
  func.func @transform_6(%arg0: i32) -> (i32, i32) {
    %c0_i32 = arith.constant 0 : i32
    %c0_i32_0 = arith.constant 0 : i32
    return %arg0, %c0_i32 : i32, i32
  }
}

</mosaic_0001>

<bundles_post_ra>
// kernel: trading_reward_forward.1
= control target key start
LH: loop header
LB: loop body
LE: loop exit
PB: predicated region body
PF: predicated region fallthrough
CT: control target
= control target key end

     0   :  { %11 = vsyncpa [#allocation3], 0  ;;  %s1020_s0 = inlined_call_operand.hbm [shape: f32[8,128], index: 0, kind: input, shape index: {}]   ;;  %s1021_s1 = inlined_call_operand.hbm [shape: f32[128,128], index: 1, kind: input, shape index: {}]   ;;  %s1022_s2 = inlined_call_operand.hbm [shape: f32[128,128], index: 2, kind: input, shape index: {}]   ;;  %s1023_s3 = inlined_call_operand.hbm [shape: f32[128,128], index: 3, kind: input, shape index: {}]   ;;  %s1024_s4 = inlined_call_operand.hbm [shape: f32[8,128], index: 4, kind: input, shape index: {}]   ;;  %s1025_s5 = inlined_call_operand.vmem [shape: f32[1,128], index: 5, kind: input, shape index: {}]   ;;  %s1026_s6 = inlined_call_operand.hbm [shape: f32[8,128], index: 6, kind: output, shape index: {}]  }
   0x1   :  { %12 = vsyncpa [#allocation6], 0 }
   0x2   :  { %13 = vsyncpa [#allocation9], 0 }
   0x3   :  { %14 = vsyncpa [#allocation4], 0  ;;  %s839_s21 = smov [#allocation5]   ;;  %s699_s25 = scalar_lea.hbm %s1021_s1, 2048 }
   0x4   :  { %s30_s22 = sshll.u32 %s839_s21, 4  ;;  %p700_p0 = scmp.ne.s32.totalorder %s1021_s1, %s699_s25  ;;  %s31_s22 = int_to_ptr.vmem [resolvable:$true] %s30_s22 }
   0x5   :  { %p703_p1 = scmp.lt.u32.totalorder %s699_s25, %s1021_s1 }
   0x7   :  { %p705_p2 = pnand %p703_p1, %p700_p0 }
   0x9   :  { %708 = shalt.err (!%p705_p2)
}
   0xa   :  { %s709_s30 = scalar_lea.vmem %s31_s22, 2048  ;;  %p714_p4 = scmp.lt.s32.totalorder %s31_s22, %s31_s22 }
   0xb   :  { %p710_p3 = scmp.ne.s32.totalorder %s31_s22, %s709_s30  ;;  %p715_p5 = scmp.lt.s32.totalorder %s709_s30, %s709_s30 }
   0xd   :  { %p716_p6 = por %p715_p5, %p714_p4 }
   0xf   :  { %p717_p7 = pnand %p716_p6, %p710_p3 }
  0x11   :  { %720 = shalt.err (!%p717_p7)
}
  0x12   :  { %s840_s7 = smov 128   ;;  %s841_s8 = smov 8  }
  0x13   :  { %36 = dma.hbm_to_vmem [thread:$0]  %s1021_s1, 2048, %s31_s22, [#allocation6], %s840_s7, %s840_s7, %s841_s8  }
  0x14   :  { %s842_s11 = smov [#allocation8]   ;;  %s843_s13 = smov [#allocation2]  }
  0x15   :  { %s54_s12 = sshll.u32 %s842_s11, 4  ;;  %s21_s14 = sshll.u32 %s843_s13, 4  ;;  %s55_s12 = int_to_ptr.vmem [resolvable:$true] %s54_s12  ;;  %s22_s14 = int_to_ptr.vmem [resolvable:$true] %s21_s14 }
  0x16   :  { %s721_s17 = scalar_lea.hbm %s1023_s3, 2048 }
  0x17   :  { %p722_p8 = scmp.ne.s32.totalorder %s1023_s3, %s721_s17  ;;  %p725_p9 = scmp.lt.u32.totalorder %s721_s17, %s1023_s3 }
  0x19   :  { %p727_p10 = pnand %p725_p9, %p722_p8 }
  0x1b   :  { %730 = shalt.err (!%p727_p10)
}
  0x1c   :  { %s731_s1 = scalar_lea.vmem %s55_s12, 2048  ;;  %p736_p12 = scmp.lt.s32.totalorder %s55_s12, %s55_s12 }
  0x1d   :  { %p732_p11 = scmp.ne.s32.totalorder %s55_s12, %s731_s1  ;;  %p737_p13 = scmp.lt.s32.totalorder %s731_s1, %s731_s1 }
  0x1f   :  { %p738_p0 = por %p737_p13, %p736_p12 }
  0x21   :  { %p739_p1 = pnand %p738_p0, %p732_p11 }
  0x23   :  { %742 = shalt.err (!%p739_p1)
}
  0x24   :  { %60 = dma.hbm_to_vmem [thread:$0]  %s1023_s3, 2048, %s55_s12, [#allocation9], %s840_s7, %s840_s7, %s841_s8  }
  0x25   :  { %s743_s26 = scalar_lea.hbm %s1020_s0, 128 }
  0x26   :  { %p744_p2 = scmp.ne.s32.totalorder %s1020_s0, %s743_s26  ;;  %p747_p3 = scmp.lt.u32.totalorder %s743_s26, %s1020_s0 }
  0x28   :  { %p749_p4 = pnand %p747_p3, %p744_p2 }
  0x2a   :  { %752 = shalt.err (!%p749_p4)
}
  0x2b   :  { %s753_s9 = scalar_lea.vmem %s22_s14, 128  ;;  %p758_p6 = scmp.lt.s32.totalorder %s22_s14, %s22_s14 }
  0x2c   :  { %p754_p5 = scmp.ne.s32.totalorder %s22_s14, %s753_s9  ;;  %p759_p7 = scmp.lt.s32.totalorder %s753_s9, %s753_s9 }
  0x2e   :  { %p760_p8 = por %p759_p7, %p758_p6 }
  0x30   :  { %p761_p9 = pnand %p760_p8, %p754_p5 }
  0x32   :  { %764 = shalt.err (!%p761_p9)
}
  0x33   :  { %24 = dma.hbm_to_vmem [thread:$0]  %s1020_s0, 128, %s22_s14, [#allocation3]  }
  0x34   :  { %s844_s11 = smov [#allocation7]   ;;  %s845_s13 = smov [#allocation10]  }
  0x35   :  { %s42_s12 = sshll.u32 %s844_s11, 4  ;;  %s67_s15 = sshll.u32 %s845_s13, 4  ;;  %s43_s12 = int_to_ptr.vmem [resolvable:$true] %s42_s12  ;;  %s68_s15 = int_to_ptr.vmem [resolvable:$true] %s67_s15 }
  0x36   :  { %s765_s18 = scalar_lea.hbm %s1022_s2, 2048 }
  0x37   :  { %p766_p10 = scmp.ne.s32.totalorder %s1022_s2, %s765_s18  ;;  %p769_p11 = scmp.lt.u32.totalorder %s765_s18, %s1022_s2 }
  0x39   :  { %p771_p12 = pnand %p769_p11, %p766_p10 }
  0x3b   :  { %774 = shalt.err (!%p771_p12)
}
  0x3c   :  { %s775_s0 = scalar_lea.vmem %s43_s12, 2048  ;;  %p780_p0 = scmp.lt.s32.totalorder %s43_s12, %s43_s12 }
  0x3d   :  { %p776_p13 = scmp.ne.s32.totalorder %s43_s12, %s775_s0  ;;  %p781_p1 = scmp.lt.s32.totalorder %s775_s0, %s775_s0 }
  0x3f   :  { %p782_p2 = por %p781_p1, %p780_p0 }
  0x41   :  { %p783_p3 = pnand %p782_p2, %p776_p13 }
  0x43   :  { %786 = shalt.err (!%p783_p3)
}
  0x44   :  { %48 = dma.hbm_to_vmem [thread:$0]  %s1022_s2, 2048, %s43_s12, [#allocation6], %s840_s7, %s840_s7, %s841_s8  }
  0x45   :  { %s787_s25 = scalar_lea.hbm %s1024_s4, 128 }
  0x46   :  { %p788_p4 = scmp.ne.s32.totalorder %s1024_s4, %s787_s25  ;;  %p791_p5 = scmp.lt.u32.totalorder %s787_s25, %s1024_s4 }
  0x48   :  { %p793_p6 = pnand %p791_p5, %p788_p4 }
  0x4a   :  { %796 = shalt.err (!%p793_p6)
}
  0x4b   :  { %s797_s30 = scalar_lea.vmem %s68_s15, 128  ;;  %p802_p8 = scmp.lt.s32.totalorder %s68_s15, %s68_s15 }
  0x4c   :  { %p798_p7 = scmp.ne.s32.totalorder %s68_s15, %s797_s30  ;;  %p803_p9 = scmp.lt.s32.totalorder %s797_s30, %s797_s30 }
  0x4e   :  { %p804_p10 = por %p803_p9, %p802_p8 }
  0x50   :  { %p805_p11 = pnand %p804_p10, %p798_p7 }
  0x52   :  { %808 = shalt.err (!%p805_p11)
}
  0x53   :  { %70 = dma.hbm_to_vmem [thread:$0]  %s1024_s4, 128, %s68_s15, [#allocation9]  }
  0x54   :  { %831 = dma.done.wait [#allocation3], 128  }
  0x55   :  { %832 = vsyncadd [#allocation3], 4294967168 }
  0x56   :  { %833 = dma.done.wait [#allocation6], 4096  }
  0x57   :  { %834 = vsyncadd [#allocation6], 4294963200 }
  0x58   :  { %835 = dma.done.wait [#allocation9], 2176  }
  0x59   :  { %836 = vsyncadd [#allocation9], 4294965120  ;;  %v846_v0 = vmov 0.0|0.0   ;;  %vm847_vm0 = vmmov 0   ;;  %v848_v1 = vmov 0.0   ;;  %v90_v2 = vld [vmem:[#allocation5] sm:$0xff]  ;;  %v106_v30 = vlaneseq }
  0x5a   :  { %610 = vmatprep.subr.bf16.mxu0 %v846_v0  ;;  %537 = vmatprep.mubr.msk.f32.mxu0 %vm847_vm0, %v848_v1  ;;  %v91_v3 = vld [vmem:[#allocation5 + $0x8] sm:$0xff]  ;;  %v92_v4 = vld [vmem:[#allocation5 + $0x10] sm:$0xff]  ;;  %v93_v6 = vld [vmem:[#allocation5 + $0x18] sm:$0xff]  ;;  %s849_s9 = smov [#allocation11]  }
  0x5b   :  { %634 = vmatprep.subr.bf16.mxu1 %v846_v0  ;;  %572 = vmatprep.mubr.msk.f32.mxu1 %vm847_vm0, %v848_v1  ;;  %v611_v5 = vpack.c.bf16 %v91_v3, %v90_v2  ;;  %v614_v7 = vpack.c.bf16 %v93_v6, %v92_v4  ;;  %v94_v8 = vld [vmem:[#allocation5 + $0x20] sm:$0xff]  ;;  %v95_v9 = vld [vmem:[#allocation5 + $0x28] sm:$0xff]  ;;  %v96_v11 = vld [vmem:[#allocation5 + $0x30] sm:$0xff]  ;;  %v971_v31 = vshrl.u32 %v106_v30, 7  ;;  %s442_s3 = sshll.u32 %s849_s9, 4  ;;  %s443_s3 = int_to_ptr.vmem [resolvable:$true] %s442_s3 }
  0x5c   :  { %v617_v10 = vpack.c.bf16 %v95_v9, %v94_v8  ;;  %v97_v12 = vld [vmem:[#allocation5 + $0x38] sm:$0xff]  ;;  %v98_v14 = vld [vmem:[#allocation5 + $0x40] sm:$0xff]  ;;  %v99_v15 = vld [vmem:[#allocation5 + $0x48] sm:$0xff]  ;;  %s809_s10 = scalar_lea.vmem %s443_s3, 128  ;;  %p814_p13 = scmp.lt.s32.totalorder %s443_s3, %s443_s3 }
  0x5d   :  { %612 = vmatpush3.bf16.msra.mxu0 %v611_v5  ;;  %v620_v13 = vpack.c.bf16 %v97_v12, %v96_v11  ;;  %v623_v16 = vpack.c.bf16 %v99_v15, %v98_v14  ;;  %v100_v17 = vld [vmem:[#allocation5 + $0x50] sm:$0xff]  ;;  %v101_v18 = vld [vmem:[#allocation5 + $0x58] sm:$0xff]  ;;  %v102_v20 = vld [vmem:[#allocation5 + $0x60] sm:$0xff]  ;;  %v108_v32 = vsub.s32 0, %v971_v31  ;;  %v195_v4 = vsub.s32 1, %v971_v31  ;;  %p810_p12 = scmp.ne.s32.totalorder %s443_s3, %s809_s10  ;;  %p815_p0 = scmp.lt.s32.totalorder %s809_s10, %s809_s10 }
  0x5e   :  { %613 = vmatprep.subr.bf16.mxu0 %v846_v0  ;;  %v626_v19 = vpack.c.bf16 %v101_v18, %v100_v17  ;;  %v103_v21 = vld [vmem:[#allocation5 + $0x68] sm:$0xff]  ;;  %v104_v23 = vld [vmem:[#allocation5 + $0x70] sm:$0xff]  ;;  %v105_v24 = vld [vmem:[#allocation5 + $0x78] sm:$0xff]  ;;  %v200_v5 = vsub.s32 2, %v971_v31  ;;  %v222_v14 = vsub.s32 3, %v971_v31 }
  0x5f   :  { %v629_v22 = vpack.c.bf16 %v103_v21, %v102_v20  ;;  %v632_v25 = vpack.c.bf16 %v105_v24, %v104_v23  ;;  %v965_v26 = vld [vmem:[#allocation2] sm:$0xff]  ;;  %v204_v27 = vld [vmem:[#allocation7] sm:$0xff]  ;;  %v205_v28 = vld [vmem:[#allocation7 + $0x8] sm:$0xff]  ;;  %p816_p1 = por %p815_p0, %p814_p13 }
  0x60   :  { %v635_v29 = vpack.c.bf16 %v205_v28, %v204_v27  ;;  %v974_v33 = vld [vmem:[#allocation10] sm:$0xff]  ;;  %v206_v39 = vld [vmem:[#allocation7 + $0x10] sm:$0xff]  ;;  %v207_v40 = vld [vmem:[#allocation7 + $0x18] sm:$0xff] }
  0x61   :  { %615 = vmatpush3.bf16.msra.mxu0 %v614_v7  ;;  %v109_v34 = vrot.slane %v974_v33, %v108_v32  ;;  %v638_v41 = vpack.c.bf16 %v207_v40, %v206_v39  ;;  %v208_v42 = vld [vmem:[#allocation7 + $0x20] sm:$0xff]  ;;  %v209_v43 = vld [vmem:[#allocation7 + $0x28] sm:$0xff]  ;;  %v210_v45 = vld [vmem:[#allocation7 + $0x30] sm:$0xff]  ;;  %v196_v7 = vrot.slane %v974_v33, %v195_v4  ;;  %v223_v15 = vrot.slane %v974_v33, %v222_v14  ;;  %p817_p2 = pnand %p816_p1, %p810_p12 }
  0x62   :  { %616 = vmatprep.subr.bf16.mxu0 %v846_v0  ;;  %636 = vmatpush3.bf16.msra.mxu1 %v635_v29  ;;  %v641_v44 = vpack.c.bf16 %v209_v43, %v208_v42  ;;  %v211_v46 = vld [vmem:[#allocation7 + $0x38] sm:$0xff]  ;;  %v212_v48 = vld [vmem:[#allocation7 + $0x40] sm:$0xff]  ;;  %v213_v49 = vld [vmem:[#allocation7 + $0x48] sm:$0xff] }
  0x63   :  { %637 = vmatprep.subr.bf16.mxu1 %v846_v0  ;;  %v644_v47 = vpack.c.bf16 %v211_v46, %v210_v45  ;;  %v647_v50 = vpack.c.bf16 %v213_v49, %v212_v48  ;;  %v214_v51 = vld [vmem:[#allocation7 + $0x50] sm:$0xff]  ;;  %v215_v52 = vld [vmem:[#allocation7 + $0x58] sm:$0xff]  ;;  %v216_v54 = vld [vmem:[#allocation7 + $0x60] sm:$0xff] }
  0x64   :  { %v650_v53 = vpack.c.bf16 %v215_v52, %v214_v51  ;;  %v217_v55 = vld [vmem:[#allocation7 + $0x68] sm:$0xff]  ;;  %v218_v57 = vld [vmem:[#allocation7 + $0x70] sm:$0xff]  ;;  %v219_v58 = vld [vmem:[#allocation7 + $0x78] sm:$0xff] }
  0x65   :  { %618 = vmatpush3.bf16.msra.mxu0 %v617_v10  ;;  %v653_v56 = vpack.c.bf16 %v217_v55, %v216_v54  ;;  %v656_v59 = vpack.c.bf16 %v219_v58, %v218_v57  ;;  %v201_v10 = vrot.slane %v974_v33, %v200_v5  ;;  %v342_v20 = vld [vmem:[#allocation8] sm:$0xff]  ;;  %v343_v21 = vld [vmem:[#allocation8 + $0x8] sm:$0xff]  ;;  %v345_v24 = vld [vmem:[#allocation8 + $0x18] sm:$0xff] }
  0x66   :  { %619 = vmatprep.subr.bf16.mxu0 %v846_v0  ;;  %639 = vmatpush3.bf16.msra.mxu1 %v638_v41  ;;  %v659_v23 = vpack.c.bf16 %v343_v21, %v342_v20  ;;  %v346_v48 = vld [vmem:[#allocation8 + $0x20] sm:$0xff]  ;;  %v347_v49 = vld [vmem:[#allocation8 + $0x28] sm:$0xff]  ;;  %v348_v51 = vld [vmem:[#allocation8 + $0x30] sm:$0xff] }
  0x67   :  { %640 = vmatprep.subr.bf16.mxu1 %v846_v0  ;;  %v349_v52 = vld [vmem:[#allocation8 + $0x38] sm:$0xff]  ;;  %v350_v54 = vld [vmem:[#allocation8 + $0x40] sm:$0xff]  ;;  %v351_v55 = vld [vmem:[#allocation8 + $0x48] sm:$0xff] }
  0x68   :  { %v353_v57 = vld [vmem:[#allocation8 + $0x58] sm:$0xff] }
  0x69   :  { %621 = vmatpush3.bf16.msra.mxu0 %v620_v13 }
  0x6a   :  { %622 = vmatprep.subr.bf16.mxu0 %v846_v0  ;;  %642 = vmatpush3.bf16.msra.mxu1 %v641_v44 }
  0x6b   :  { %643 = vmatprep.subr.bf16.mxu1 %v846_v0 }
  0x6d   :  { %624 = vmatpush3.bf16.msra.mxu0 %v623_v16 }
  0x6e   :  { %625 = vmatprep.subr.bf16.mxu0 %v846_v0  ;;  %645 = vmatpush3.bf16.msra.mxu1 %v644_v47 }
  0x6f   :  { %646 = vmatprep.subr.bf16.mxu1 %v846_v0 }
  0x71   :  { %627 = vmatpush3.bf16.msra.mxu0 %v626_v19 }
  0x72   :  { %628 = vmatprep.subr.bf16.mxu0 %v846_v0  ;;  %648 = vmatpush3.bf16.msra.mxu1 %v647_v50  ;;  %v665_v50 = vpack.c.bf16 %v347_v49, %v346_v48 }
  0x73   :  { %649 = vmatprep.subr.bf16.mxu1 %v846_v0 }
  0x75   :  { %630 = vmatpush3.bf16.msra.mxu0 %v629_v22  ;;  %v344_v22 = vld [vmem:[#allocation8 + $0x10] sm:$0xff] }
  0x76   :  { %631 = vmatprep.subr.bf16.mxu0 %v846_v0  ;;  %651 = vmatpush3.bf16.msra.mxu1 %v650_v53  ;;  %v668_v53 = vpack.c.bf16 %v349_v52, %v348_v51 }
  0x77   :  { %652 = vmatprep.subr.bf16.mxu1 %v846_v0 }
  0x79   :  { %633 = vmatpush3.bf16.msra.mxu0 %v632_v25  ;;  %v662_v25 = vpack.c.bf16 %v345_v24, %v344_v22 }
  0x7a   :  { %658 = vmatprep.subr.bf16.mxu0 %v846_v0  ;;  %654 = vmatpush3.bf16.msra.mxu1 %v653_v56  ;;  %v671_v56 = vpack.c.bf16 %v351_v55, %v350_v54 }
  0x7b   :  { %655 = vmatprep.subr.bf16.mxu1 %v846_v0 }
  0x7c   :  { %538 = vmatmul.mubr.f32.vlgmr.msra.gmra.mrb[0].mxu0 %v965_v26 }
  0x7d   :  { %607 = vmatprep.mubr.msk.f32.mxu0 %vm847_vm0, %v848_v1  ;;  %660 = vmatpush3.bf16.msra.mxu0 %v659_v23 }
  0x7e   :  { %657 = vmatpush3.bf16.msra.mxu1 %v656_v59  ;;  %661 = vmatprep.subr.bf16.mxu0 %v846_v0  ;;  %v354_v59 = vld [vmem:[#allocation8 + $0x60] sm:$0xff] }
  0x81   :  { %663 = vmatpush3.bf16.msra.mxu0 %v662_v25 }
  0x82   :  { %664 = vmatprep.subr.bf16.mxu0 %v846_v0 }
  0x85   :  { %666 = vmatpush3.bf16.msra.mxu0 %v665_v50 }
  0x86   :  { %667 = vmatprep.subr.bf16.mxu0 %v846_v0 }
  0x89   :  { %669 = vmatpush3.bf16.msra.mxu0 %v668_v53 }
  0x8a   :  { %670 = vmatprep.subr.bf16.mxu0 %v846_v0 }
  0x8d   :  { %672 = vmatpush3.bf16.msra.mxu0 %v671_v56 }
  0x8e   :  { %673 = vmatprep.subr.bf16.mxu0 %v846_v0 }
 0x14f   :  { %v176_v35 = vpop.f32.mrb[0].mxu0 }
 0x150   :  { %v177_v36 = vadd.f32 %v176_v35, %v109_v34  ;;  %v539_v37 = vpop.f32.mrb[1].mxu0 }
 0x151   :  { %v314_v37 = vsub.s32 5, %v971_v31 }
 0x152   :  { %180 = vadd.xlane.f32.xlu0 %v177_v36  ;;  %v182_v38 = vmul.f32 %v177_v36, %v177_v36 }
 0x153   :  { %v315_v42 = vrot.slane %v974_v33, %v314_v37 }
 0x156   :  { %183 = vadd.xlane.f32.xlu0 %v182_v38 }
 0x1df   :  { %v181_v60 = vpop.xlane.xlu0 %180 }
 0x1e0   :  { %v185_v61 = vmul.f32 0.0078125, %v181_v60  ;;  %v355_v60 = vld [vmem:[#allocation8 + $0x68] sm:$0xff] }
 0x1e2   :  { %v187_v63 = vmul.f32 %v185_v61, %v185_v61  ;;  %v191_v6 = vsub.f32 %v177_v36, %v185_v61  ;;  %v309_v36 = vsub.s32 4, %v971_v31  ;;  %v677_v61 = vpack.c.bf16 %v355_v60, %v354_v59 }
 0x1e3   :  { %v184_v62 = vpop.xlane.xlu0 %183 }
 0x1e4   :  { %v186_v1 = vmul.f32 0.0078125, %v184_v62  ;;  %v310_v39 = vrot.slane %v974_v33, %v309_v36  ;;  %v356_v62 = vld [vmem:[#allocation8 + $0x70] sm:$0xff] }
 0x1e6   :  { %v188_v2 = vsub.f32 %v186_v1, %v187_v63  ;;  %v357_v63 = vld [vmem:[#allocation8 + $0x78] sm:$0xff] }
 0x1e7   :  { %v680_v1 = vpack.c.bf16 %v357_v63, %v356_v62 }
 0x1e8   :  { %v189_v3 = vadd.f32 1e-05, %v188_v2 }
 0x1ea   :  { %693 = vrsqrt.f32 %v189_v3 }
 0x1f4   :  { %v694_v8 = vpop.eup %693 }
 0x1f5   :  { %v192_v9 = vmul.f32 %v694_v8, %v191_v6 }
 0x1f7   :  { %v197_v11 = vmul.f32 %v196_v7, %v192_v9  ;;  %v334_v9 = vsub.s32 6, %v971_v31 }
 0x1f9   :  { %v202_v12 = vadd.f32 %v201_v10, %v197_v11  ;;  %v339_v10 = vsub.s32 7, %v971_v31 }
 0x1fb   :  { %v203_v13 = vmax.f32 %v202_v12, 0.0  ;;  %v335_v12 = vrot.slane %v974_v33, %v334_v9 }
 0x1fd   :  { %573 = vmatmul.mubr.f32.vlgmr.msra.gmra.mrb[0].mxu1 %v203_v13 }
 0x2d0   :  { %v290_v16 = vpop.f32.mrb[0].mxu1 }
 0x2d1   :  { %v291_v17 = vadd.f32 %v290_v16, %v223_v15  ;;  %v574_v18 = vpop.f32.mrb[1].mxu1 }
 0x2d3   :  { %294 = vadd.xlane.f32.xlu1 %v291_v17  ;;  %v296_v19 = vmul.f32 %v291_v17, %v291_v17 }
 0x2d7   :  { %297 = vadd.xlane.f32.xlu1 %v296_v19 }
 0x360   :  { %v295_v27 = vpop.xlane.xlu1 %294 }
 0x361   :  { %v299_v28 = vmul.f32 0.0078125, %v295_v27 }
 0x363   :  { %v301_v30 = vmul.f32 %v299_v28, %v299_v28  ;;  %v305_v38 = vsub.f32 %v291_v17, %v299_v28  ;;  %v453_v17 = vld [vmem:[%s1025_s5] ss:$0 sm:$0xff] }
 0x364   :  { %v298_v29 = vpop.xlane.xlu1 %297 }
 0x365   :  { %v300_v32 = vmul.f32 0.0078125, %v298_v29 }
 0x367   :  { %v302_v34 = vsub.f32 %v300_v32, %v301_v30 }
 0x369   :  { %v303_v35 = vadd.f32 1e-05, %v302_v34 }
 0x36b   :  { %695 = vrsqrt.f32 %v303_v35 }
 0x375   :  { %v696_v40 = vpop.eup %695 }
 0x376   :  { %v306_v41 = vmul.f32 %v696_v40, %v305_v38 }
 0x378   :  { %v311_v43 = vmul.f32 %v310_v39, %v306_v41 }
 0x37a   :  { %v316_v44 = vadd.f32 %v315_v42, %v311_v43 }
 0x37c   :  { %v317_v45 = vadd.f32 %v316_v44, %v965_v26  ;;  %v352_v26 = vld [vmem:[#allocation8 + $0x50] sm:$0xff] }
 0x37d   :  { %v674_v58 = vpack.c.bf16 %v353_v57, %v352_v26 }
 0x37e   :  { %v318_v46 = vmax.f32 %v317_v45, 0.0 }
 0x37f   :  { %675 = vmatpush3.bf16.msra.mxu0 %v674_v58 }
 0x380   :  { %319 = vadd.xlane.f32.xlu0 %v318_v46  ;;  %v321_v47 = vmul.f32 %v318_v46, %v318_v46  ;;  %676 = vmatprep.subr.bf16.mxu0 %v846_v0 }
 0x382   :  { %322 = vadd.xlane.f32.xlu1 %v321_v47 }
 0x383   :  { %678 = vmatpush3.bf16.msra.mxu0 %v677_v61 }
 0x384   :  { %679 = vmatprep.subr.bf16.mxu0 %v846_v0  ;;  %v340_v0 = vrot.slane %v974_v33, %v339_v10 }
 0x387   :  { %681 = vmatpush3.bf16.msra.mxu0 %v680_v1 }
 0x40d   :  { %v320_v2 = vpop.xlane.xlu0 %319 }
 0x40e   :  { %v324_v3 = vmul.f32 0.0078125, %v320_v2 }
 0x40f   :  { %v323_v4 = vpop.xlane.xlu1 %322 }
 0x410   :  { %v326_v5 = vmul.f32 %v324_v3, %v324_v3  ;;  %v325_v6 = vmul.f32 0.0078125, %v323_v4  ;;  %v330_v11 = vsub.f32 %v318_v46, %v324_v3 }
 0x412   :  { %v327_v7 = vsub.f32 %v325_v6, %v326_v5 }
 0x414   :  { %v328_v8 = vadd.f32 1e-05, %v327_v7 }
 0x416   :  { %697 = vrsqrt.f32 %v328_v8 }
 0x420   :  { %v698_v13 = vpop.eup %697 }
 0x421   :  { %v331_v14 = vmul.f32 %v698_v13, %v330_v11 }
 0x423   :  { %v336_v15 = vmul.f32 %v335_v12, %v331_v14 }
 0x425   :  { %v341_v16 = vadd.f32 %v340_v0, %v336_v15 }
 0x427   :  { %608 = vmatmul.mubr.f32.vlgmr.msra.gmra.mrb[2].mxu0 %v341_v16 }
 0x4fa   :  { %v431_v18 = vpop.f32.mrb[2].mxu0 }
 0x4fb   :  { %v432_v19 = vadd.f32 %v453_v17, %v431_v18  ;;  %v609_v20 = vpop.f32.mrb[3].mxu0 }
 0x4fd   :  { %435 = vst [vmem:[#allocation11] sm:$0xff] %v432_v19 }
 0x4fe   :  { %820 = shalt.err (!%p817_p2)
}
 0x4ff   :  { %s821_s13 = scalar_lea.hbm %s1026_s6, 128 }
 0x500   :  { %p822_p3 = scmp.ne.s32.totalorder %s1026_s6, %s821_s13  ;;  %p825_p4 = scmp.lt.u32.totalorder %s821_s13, %s1026_s6 }
 0x502   :  { %p827_p5 = pnand %p825_p4, %p822_p3 }
 0x504   :  { %830 = shalt.err (!%p827_p5)
}
 0x505   :  { %445 = dma.vmem_to_hbm [thread:$0]  %s443_s3, 128, %s1026_s6, [#allocation4]  }
 0x506   :  { %837 = dma.done.wait [#allocation4], 128  }
 0x507   :  { %838 = vsyncadd [#allocation4], 4294967168 }
 0x508   :  { %449 = vsyncpa [#allocation3], 1 }
 0x509   :  { %450 = vsyncpa [#allocation6], 1 }
 0x50a   :  { %451 = vsyncpa [#allocation9], 1 }
 0x50b   :  { %452 = vsyncpa [#allocation4], 1 }

</bundles_post_ra>
